<compile_context>
chip_gen: v6e
topology: v6e:2x2x1
jax: 0.10.0
libtpu: 0.0.40
codegen_flags: <defaults>
</compile_context>

<pallas_src>
import jax
import jax.numpy as jnp
from jax.experimental import pallas as pl
from jax.experimental.pallas import tpu as pltpu

# ----------------------------- model config ---------------------------------
NUM_WAVELENGTHS = 16
IN_DIM = 2 * NUM_WAVELENGTHS          # 32
L1, L2, L3 = 128, 512, 64
OUT_DIM = 20

L3_PAD = 128                          # lane-pad 64 -> 128 (full-lane matmul N)
OUT_PAD = 32                          # lane-pad 20 -> 32 (narrow output stream)
TB_MAX = 2048                         # max batch tile (VMEM-safe on v5e/v6e/v7x)

COMPUTE_DTYPE = jnp.bfloat16          # MXU operand dtype (accumulation stays f32)
VMEM_LIMIT_BYTES = 48 * 1024 * 1024   # above 32 MiB scoped default, < v7x 64 MiB


def _round_up(n, m):
    return ((n + m - 1) // m) * m


def _choose_tb(batch, tb_max=TB_MAX):
    """Batch tile: aim for >=4 grid steps (>=2 per v7x TensorCore) when the
    batch allows; multiple of 16 for bf16 sublane packing."""
    quarter = _round_up(max(1, (batch + 3) // 4), 16)
    return max(16, min(tb_max, quarter))


# ------------------------------ Pallas kernel -------------------------------
def mlp_kernel(x_ref,
               w1_ref, b1_ref,
               w2_ref, b2_ref,
               w3_ref, b3_ref,
               w4_ref, b4_ref,
               o_ref):
    cdt = w1_ref.dtype  # bf16 operands; dots accumulate in f32 on the MXU

    h = jnp.dot(x_ref[...], w1_ref[...],
                preferred_element_type=jnp.float32) + b1_ref[...]
    h = jnp.maximum(h, 0.0).astype(cdt)

    h = jnp.dot(h, w2_ref[...],
                preferred_element_type=jnp.float32) + b2_ref[...]
    h = jnp.maximum(h, 0.0).astype(cdt)

    h = jnp.dot(h, w3_ref[...],
                preferred_element_type=jnp.float32) + b3_ref[...]
    h = jnp.maximum(h, 0.0).astype(cdt)

    h = jnp.dot(h, w4_ref[...],
                preferred_element_type=jnp.float32) + b4_ref[...]

    o_ref[...] = h.astype(o_ref.dtype)


# --------------------------- one-time param prep -----------------------------
def prepare_params(params):
    """Pad + cast once; returns kernel-ready tensors (call outside hot loop)."""
    prep = {
        "w1": params["w1"].astype(COMPUTE_DTYPE),                            # (32, 128)
        "w2": params["w2"].astype(COMPUTE_DTYPE),                            # (128, 512)
        "w3": jnp.pad(params["w3"],
                      ((0, 0), (0, L3_PAD - L3))).astype(COMPUTE_DTYPE),     # (512, 128)
        "w4": jnp.pad(params["w4"],
                      ((0, L3_PAD - L3), (0, OUT_PAD - OUT_DIM))
                      ).astype(COMPUTE_DTYPE),                               # (128, 32)
        "b1": params["b1"],                                                  # (1, 128) f32
        "b2": params["b2"],                                                  # (1, 512) f32
        "b3": jnp.pad(params["b3"], ((0, 0), (0, L3_PAD - L3))),             # (1, 128) f32
        "b4": jnp.pad(params["b4"], ((0, 0), (0, OUT_PAD - OUT_DIM))),       # (1, 32)  f32
    }
    return jax.tree_util.tree_map(jax.block_until_ready, prep)


# ------------------------------ host wrapper ---------------------------------
@jax.jit
def trainable_mlp_forward(x, prep):
    """x: [B, IN_DIM] float32.  prep: output of prepare_params()."""
    B = x.shape[0]
    tb = _choose_tb(B)
    B_pad = _round_up(B, tb)
    grid = (B_pad // tb,)

    # ragged batch -> zero-pad rows; cast MXU operand to bf16
    if B_pad != B:
        x = jnp.pad(x, ((0, B_pad - B), (0, 0)))
    x = x.astype(COMPUTE_DTYPE)

    # Weights/biases are tiny -> whole tensor resident every grid step
    # (grid-invariant index_map, so Pallas never re-fetches them).
    def whole(shape):
        return pl.BlockSpec(shape, lambda i: (0, 0))

    flops = 2 * B_pad * (IN_DIM * L1 + L1 * L2 + L2 * L3_PAD + L3_PAD * OUT_PAD)
    bytes_accessed = (
        B_pad * IN_DIM * 2
        + sum(prep[k].size * prep[k].dtype.itemsize for k in prep)
        + B_pad * OUT_PAD * 4)
    cost = pl.CostEstimate(flops=flops, transcendentals=0,
                           bytes_accessed=bytes_accessed)

    out = pl.pallas_call(
        mlp_kernel,
        out_shape=jax.ShapeDtypeStruct((B_pad, OUT_PAD), jnp.float32),
        grid_spec=pltpu.PrefetchScalarGridSpec(
            num_scalar_prefetch=0,
            grid=grid,
            in_specs=[
                pl.BlockSpec((tb, IN_DIM), lambda i: (i, 0)),   # x tile
                whole((IN_DIM, L1)),      whole((1, L1)),
                whole((L1, L2)),          whole((1, L2)),
                whole((L2, L3_PAD)),      whole((1, L3_PAD)),
                whole((L3_PAD, OUT_PAD)), whole((1, OUT_PAD)),
            ],
            out_specs=pl.BlockSpec((tb, OUT_PAD), lambda i: (i, 0)),
        ),
        compiler_params=pltpu.CompilerParams(
            dimension_semantics=("parallel",),
            vmem_limit_bytes=VMEM_LIMIT_BYTES,
        ),
        cost_estimate=cost,
    )(x, prep["w1"], prep["b1"], prep["w2"], prep["b2"],
      prep["w3"], prep["b3"], prep["w4"], prep["b4"])

    # strip batch-tail and lane padding (fused inside this jit)
    return out[:B, :OUT_DIM]


# --------------------------- deterministic params ---------------------------
def init_params(key):
    dims = [(IN_DIM, L1), (L1, L2), (L2, L3), (L3, OUT_DIM)]
    params = {}
    for idx, (fan_in, fan_out) in enumerate(dims, start=1):
        key, kw, kb = jax.random.split(key, 3)
        bound = 1.0 / jnp.sqrt(fan_in)   # matches torch.nn.Linear default init range
        # stored already transposed: [in_features, out_features]
        params[f"w{idx}"] = jax.random.uniform(
            kw, (fan_in, fan_out), jnp.float32, minval=-bound, maxval=bound)
        params[f"b{idx}"] = jax.random.uniform(
            kb, (1, fan_out), jnp.float32, minval=-bound, maxval=bound)
    return params


# --------------------------------- main --------------------------------------
if __name__ == "__main__":
    key = jax.random.PRNGKey(0)
    key, kx = jax.random.split(key)

    B = 16
    x = jax.random.normal(kx, (B, IN_DIM), jnp.float32)
    params = init_params(key)

    prep = prepare_params(params)            # one-time pad + cast
    out = trainable_mlp_forward(x, prep)
    out = jax.block_until_ready(out)
    assert out.shape == (B, OUT_DIM)

    # Reference 1: same bf16-quantized operands, f32 accumulation (tight check
    # of kernel semantics, independent of the bf16 cast itself).
    def ref_quant(x, p):
        q = lambda a: a.astype(jnp.bfloat16).astype(jnp.float32)
        h = jnp.maximum(q(x) @ q(p["w1"]) + p["b1"], 0.0)
        h = jnp.maximum(q(h) @ q(p["w2"]) + p["b2"], 0.0)
        h = jnp.maximum(q(h) @ q(p["w3"]) + p["b3"], 0.0)
        return q(h) @ q(p["w4"]) + p["b4"]

    # Reference 2: plain f32 math (module semantics; loose tolerance because
    # the kernel intentionally uses bf16 MXU operands).
    def ref_f32(x, p):
        h = jnp.maximum(x @ p["w1"] + p["b1"], 0.0)
        h = jnp.maximum(h @ p["w2"] + p["b2"], 0.0)
        h = jnp.maximum(h @ p["w3"] + p["b3"], 0.0)
        return h @ p["w4"] + p["b4"]

    assert bool(jnp.allclose(out, ref_quant(x, params), atol=1e-3, rtol=1e-3))
    assert bool(jnp.allclose(out, ref_f32(x, params), atol=2e-1, rtol=2e-1))

    print("KERNEL_OK")
</pallas_src>

<mosaic_0001>
module attributes {stable_mosaic.version = 11 : i64} {
  func.func @mlp_kernel(%arg0: i32, %arg1: memref<16x32xbf16, #tpu.memory_space<vmem>>, %arg2: memref<32x128xbf16, #tpu.memory_space<vmem>>, %arg3: memref<1x128xf32, #tpu.memory_space<vmem>>, %arg4: memref<128x512xbf16, #tpu.memory_space<vmem>>, %arg5: memref<1x512xf32, #tpu.memory_space<vmem>>, %arg6: memref<512x128xbf16, #tpu.memory_space<vmem>>, %arg7: memref<1x128xf32, #tpu.memory_space<vmem>>, %arg8: memref<128x32xbf16, #tpu.memory_space<vmem>>, %arg9: memref<1x32xf32, #tpu.memory_space<vmem>>, %arg10: memref<16x32xf32, #tpu.memory_space<vmem>>) attributes {dimension_semantics = [#tpu.dimension_semantics<parallel>], iteration_bounds = array<i64: 1>, scalar_prefetch = 0 : i64, scratch_operands = 0 : i64, tpu.core_type = #tpu.core_type<tc>, window_params = [{transform_indices = @transform_0, window_bounds = array<i64: 16, 32>}, {pipeline_mode = #tpu.pipeline_mode<synchronous>, transform_indices = @transform_1, window_bounds = array<i64: 32, 128>}, {pipeline_mode = #tpu.pipeline_mode<synchronous>, transform_indices = @transform_2, window_bounds = array<i64: 1, 128>}, {pipeline_mode = #tpu.pipeline_mode<synchronous>, transform_indices = @transform_3, window_bounds = array<i64: 128, 512>}, {pipeline_mode = #tpu.pipeline_mode<synchronous>, transform_indices = @transform_4, window_bounds = array<i64: 1, 512>}, {pipeline_mode = #tpu.pipeline_mode<synchronous>, transform_indices = @transform_5, window_bounds = array<i64: 512, 128>}, {pipeline_mode = #tpu.pipeline_mode<synchronous>, transform_indices = @transform_6, window_bounds = array<i64: 1, 128>}, {pipeline_mode = #tpu.pipeline_mode<synchronous>, transform_indices = @transform_7, window_bounds = array<i64: 128, 32>}, {pipeline_mode = #tpu.pipeline_mode<synchronous>, transform_indices = @transform_8, window_bounds = array<i64: 1, 32>}, {transform_indices = @transform_9, window_bounds = array<i64: 16, 32>}]} {
    %c0 = arith.constant 0 : index
    %c0_0 = arith.constant 0 : index
    %0 = vector.load %arg1[%c0, %c0_0] : memref<16x32xbf16, #tpu.memory_space<vmem>>, vector<16x32xbf16>
    %c0_1 = arith.constant 0 : index
    %c0_2 = arith.constant 0 : index
    %1 = vector.load %arg2[%c0_1, %c0_2] : memref<32x128xbf16, #tpu.memory_space<vmem>>, vector<32x128xbf16>
    %cst = arith.constant dense<0.000000e+00> : vector<16x128xf32>
    %2 = tpu.matmul %0, %1, %cst {dimension_numbers = #tpu.dot_dimension_numbers<[1], [0], [0], [1], [0, 0, 1, 1], [], []>} : vector<16x32xbf16>, vector<32x128xbf16>, vector<16x128xf32> -> vector<16x128xf32>
    %c0_3 = arith.constant 0 : index
    %c0_4 = arith.constant 0 : index
    %3 = vector.load %arg3[%c0_3, %c0_4] : memref<1x128xf32, #tpu.memory_space<vmem>>, vector<1x128xf32>
    %4 = vector.broadcast %3 : vector<1x128xf32> to vector<16x128xf32>
    %5 = arith.addf %2, %4 : vector<16x128xf32>
    %cst_5 = arith.constant 0.000000e+00 : f32
    %6 = vector.broadcast %cst_5 : f32 to vector<16x128xf32>
    %7 = arith.maximumf %5, %6 : vector<16x128xf32>
    %8 = arith.truncf %7 : vector<16x128xf32> to vector<16x128xbf16>
    %c0_6 = arith.constant 0 : index
    %c0_7 = arith.constant 0 : index
    %9 = vector.load %arg4[%c0_6, %c0_7] : memref<128x512xbf16, #tpu.memory_space<vmem>>, vector<128x512xbf16>
    %cst_8 = arith.constant dense<0.000000e+00> : vector<16x512xf32>
    %10 = tpu.matmul %8, %9, %cst_8 {dimension_numbers = #tpu.dot_dimension_numbers<[1], [0], [0], [1], [0, 0, 1, 1], [], []>} : vector<16x128xbf16>, vector<128x512xbf16>, vector<16x512xf32> -> vector<16x512xf32>
    %c0_9 = arith.constant 0 : index
    %c0_10 = arith.constant 0 : index
    %11 = vector.load %arg5[%c0_9, %c0_10] : memref<1x512xf32, #tpu.memory_space<vmem>>, vector<1x512xf32>
    %12 = vector.broadcast %11 : vector<1x512xf32> to vector<16x512xf32>
    %13 = arith.addf %10, %12 : vector<16x512xf32>
    %cst_11 = arith.constant 0.000000e+00 : f32
    %14 = vector.broadcast %cst_11 : f32 to vector<16x512xf32>
    %15 = arith.maximumf %13, %14 : vector<16x512xf32>
    %16 = arith.truncf %15 : vector<16x512xf32> to vector<16x512xbf16>
    %c0_12 = arith.constant 0 : index
    %c0_13 = arith.constant 0 : index
    %17 = vector.load %arg6[%c0_12, %c0_13] : memref<512x128xbf16, #tpu.memory_space<vmem>>, vector<512x128xbf16>
    %cst_14 = arith.constant dense<0.000000e+00> : vector<16x128xf32>
    %18 = tpu.matmul %16, %17, %cst_14 {dimension_numbers = #tpu.dot_dimension_numbers<[1], [0], [0], [1], [0, 0, 1, 1], [], []>} : vector<16x512xbf16>, vector<512x128xbf16>, vector<16x128xf32> -> vector<16x128xf32>
    %c0_15 = arith.constant 0 : index
    %c0_16 = arith.constant 0 : index
    %19 = vector.load %arg7[%c0_15, %c0_16] : memref<1x128xf32, #tpu.memory_space<vmem>>, vector<1x128xf32>
    %20 = vector.broadcast %19 : vector<1x128xf32> to vector<16x128xf32>
    %21 = arith.addf %18, %20 : vector<16x128xf32>
    %cst_17 = arith.constant 0.000000e+00 : f32
    %22 = vector.broadcast %cst_17 : f32 to vector<16x128xf32>
    %23 = arith.maximumf %21, %22 : vector<16x128xf32>
    %24 = arith.truncf %23 : vector<16x128xf32> to vector<16x128xbf16>
    %c0_18 = arith.constant 0 : index
    %c0_19 = arith.constant 0 : index
    %25 = vector.load %arg8[%c0_18, %c0_19] : memref<128x32xbf16, #tpu.memory_space<vmem>>, vector<128x32xbf16>
    %cst_20 = arith.constant dense<0.000000e+00> : vector<16x32xf32>
    %26 = tpu.matmul %24, %25, %cst_20 {dimension_numbers = #tpu.dot_dimension_numbers<[1], [0], [0], [1], [0, 0, 1, 1], [], []>} : vector<16x128xbf16>, vector<128x32xbf16>, vector<16x32xf32> -> vector<16x32xf32>
    %c0_21 = arith.constant 0 : index
    %c0_22 = arith.constant 0 : index
    %27 = vector.load %arg9[%c0_21, %c0_22] : memref<1x32xf32, #tpu.memory_space<vmem>>, vector<1x32xf32>
    %28 = vector.broadcast %27 : vector<1x32xf32> to vector<16x32xf32>
    %29 = arith.addf %26, %28 : vector<16x32xf32>
    %c0_23 = arith.constant 0 : index
    %c0_24 = arith.constant 0 : index
    %30 = vector.load %arg10[%c0_23, %c0_24] : memref<16x32xf32, #tpu.memory_space<vmem>>, vector<16x32xf32>
    tpu.vector_store %arg10[%c0_23, %c0_24], %29 {strides = array<i32>} : memref<16x32xf32, #tpu.memory_space<vmem>>, vector<16x32xf32>,
    return
  }
  func.func @transform_0(%arg0: i32) -> (i32, i32) {
    %c0_i32 = arith.constant 0 : i32
    %c0_i32_0 = arith.constant 0 : i32
    return %arg0, %c0_i32 : i32, i32
  }
  func.func @transform_1(%arg0: i32) -> (i32, i32) {
    %c0_i32 = arith.constant 0 : i32
    %c0_i32_0 = arith.constant 0 : i32
    %c0_i32_1 = arith.constant 0 : i32
    return %c0_i32, %c0_i32_0 : i32, i32
  }
  func.func @transform_2(%arg0: i32) -> (i32, i32) {
    %c0_i32 = arith.constant 0 : i32
    %c0_i32_0 = arith.constant 0 : i32
    %c0_i32_1 = arith.constant 0 : i32
    return %c0_i32, %c0_i32_0 : i32, i32
  }
  func.func @transform_3(%arg0: i32) -> (i32, i32) {
    %c0_i32 = arith.constant 0 : i32
    %c0_i32_0 = arith.constant 0 : i32
    %c0_i32_1 = arith.constant 0 : i32
    return %c0_i32, %c0_i32_0 : i32, i32
  }
  func.func @transform_4(%arg0: i32) -> (i32, i32) {
    %c0_i32 = arith.constant 0 : i32
    %c0_i32_0 = arith.constant 0 : i32
    %c0_i32_1 = arith.constant 0 : i32
    return %c0_i32, %c0_i32_0 : i32, i32
  }
  func.func @transform_5(%arg0: i32) -> (i32, i32) {
    %c0_i32 = arith.constant 0 : i32
    %c0_i32_0 = arith.constant 0 : i32
    %c0_i32_1 = arith.constant 0 : i32
    return %c0_i32, %c0_i32_0 : i32, i32
  }
  func.func @transform_6(%arg0: i32) -> (i32, i32) {
    %c0_i32 = arith.constant 0 : i32
    %c0_i32_0 = arith.constant 0 : i32
    %c0_i32_1 = arith.constant 0 : i32
    return %c0_i32, %c0_i32_0 : i32, i32
  }
  func.func @transform_7(%arg0: i32) -> (i32, i32) {
    %c0_i32 = arith.constant 0 : i32
    %c0_i32_0 = arith.constant 0 : i32
    %c0_i32_1 = arith.constant 0 : i32
    return %c0_i32, %c0_i32_0 : i32, i32
  }
  func.func @transform_8(%arg0: i32) -> (i32, i32) {
    %c0_i32 = arith.constant 0 : i32
    %c0_i32_0 = arith.constant 0 : i32
    %c0_i32_1 = arith.constant 0 : i32
    return %c0_i32, %c0_i32_0 : i32, i32
  }
  func.func @transform_9(%arg0: i32) -> (i32, i32) {
    %c0_i32 = arith.constant 0 : i32
    %c0_i32_0 = arith.constant 0 : i32
    return %arg0, %c0_i32 : i32, i32
  }
}

</mosaic_0001>

<bundles_post_ra>
// kernel: trainable_mlp_forward.1
= control target key start
LH: loop header
LB: loop body
LE: loop exit
PB: predicated region body
PF: predicated region fallthrough
CT: control target
= control target key end

     0   :  { %14 = vsyncpa [#allocation3], 0  ;;  %s1397_s0 = inlined_call_operand.vmem [shape: bf16[16,32], index: 0, kind: input, shape index: {}]   ;;  %s1398_s1 = inlined_call_operand.vmem [shape: bf16[32,128], index: 1, kind: input, shape index: {}]   ;;  %s1399_s2 = inlined_call_operand.vmem [shape: f32[1,128], index: 2, kind: input, shape index: {}]   ;;  %s1400_s3 = inlined_call_operand.hbm [shape: bf16[128,512], index: 3, kind: input, shape index: {}]   ;;  %s1401_s4 = inlined_call_operand.vmem [shape: f32[1,512], index: 4, kind: input, shape index: {}]   ;;  %s1402_s5 = inlined_call_operand.hbm [shape: bf16[512,128], index: 5, kind: input, shape index: {}]   ;;  %s1403_s6 = inlined_call_operand.vmem [shape: f32[1,128], index: 6, kind: input, shape index: {}]   ;;  %s1404_s7 = inlined_call_operand.vmem [shape: bf16[128,32], index: 7, kind: input, shape index: {}]   ;;  %s1405_s8 = inlined_call_operand.vmem [shape: f32[1,32], index: 8, kind: input, shape index: {}]   ;;  %s1406_s9 = inlined_call_operand.hbm [shape: f32[16,32], index: 9, kind: output, shape index: {}]  }
   0x1   :  { %15 = vsyncpa [#allocation6], 0 }
   0x2   :  { %16 = vsyncpa [#allocation4], 0  ;;  %s1264_s30 = smov [#allocation2]  }
   0x3   :  { %s28_s10 = sshll.u32 %s1264_s30, 4  ;;  %s29_s10 = int_to_ptr.vmem [resolvable:$true] %s28_s10 }
   0x4   :  { %s1206_s11 = scalar_lea.vmem %s29_s10, 4096  ;;  %p1211_p1 = scmp.lt.s32.totalorder %s29_s10, %s29_s10 }
   0x5   :  { %p1207_p0 = scmp.ne.s32.totalorder %s29_s10, %s1206_s11  ;;  %p1212_p2 = scmp.lt.s32.totalorder %s1206_s11, %s1206_s11 }
   0x7   :  { %p1213_p3 = por %p1212_p2, %p1211_p1 }
   0x9   :  { %p1214_p4 = pnand %p1213_p3, %p1207_p0 }
   0xb   :  { %1217 = shalt.err (!%p1214_p4)
}
   0xc   :  { %s1265_s12 = smov 256   ;;  %s1266_s13 = smov 16  }
   0xd   :  { %34 = dma.hbm_to_vmem [thread:$0]  %s1400_s3, 4096, %s29_s10, [#allocation3], %s1265_s12, %s1265_s12, %s1266_s13  }
   0xe   :  { %s1267_s16 = smov [#allocation5]  }
   0xf   :  { %s42_s17 = sshll.u32 %s1267_s16, 4  ;;  %s43_s17 = int_to_ptr.vmem [resolvable:$true] %s42_s17 }
  0x10   :  { %s1226_s18 = scalar_lea.vmem %s43_s17, 4096  ;;  %p1231_p6 = scmp.lt.s32.totalorder %s43_s17, %s43_s17 }
  0x11   :  { %p1227_p5 = scmp.ne.s32.totalorder %s43_s17, %s1226_s18  ;;  %p1232_p7 = scmp.lt.s32.totalorder %s1226_s18, %s1226_s18 }
  0x13   :  { %p1233_p8 = por %p1232_p7, %p1231_p6 }
  0x15   :  { %p1234_p9 = pnand %p1233_p8, %p1227_p5 }
  0x17   :  { %1237 = shalt.err (!%p1234_p9)
}
  0x18   :  { %s1268_s19 = smov 64   ;;  %s1269_s20 = smov 4  }
  0x19   :  { %48 = dma.hbm_to_vmem [thread:$0]  %s1402_s5, 4096, %s43_s17, [#allocation6], %s1268_s19, %s1268_s19, %s1269_s20  }
  0x1a   :  { %1258 = dma.done.wait [#allocation3], 4096  }
  0x1b   :  { %1259 = vsyncadd [#allocation3], 4294963200 }
  0x1c   :  { %1260 = dma.done.wait [#allocation6], 4096  }
  0x1d   :  { %1261 = vsyncadd [#allocation6], 4294963200  ;;  %v1270_v0 = vmov 0.0   ;;  %vm1271_vm0 = vmmov 0   ;;  %v1107_v1 = vld [vmem:[%s1398_s1 + $0x8] sm:$0xff]   ;;  %v1108_v2 = vld [vmem:[%s1398_s1] sm:$0xff]  }
  0x1e   :  { %1067 = vmatprep.subr.bf16.mxu0 %v1270_v0  ;;  %1071 = vmatprep.mubr.msk.bf16.mxu0 %vm1271_vm0, %v1270_v0  ;;  %v1109_v3 = vld [vmem:[%s1397_s0] sm:$0xff]   ;;  %v1112_v5 = vld [vmem:[#allocation2 + $0xe8] ss:$16 sps:$4 sm:$0xff]   ;;  %v1114_v6 = vld [vmem:[#allocation2 + $0xec] ss:$16 sps:$4 sm:$0xff]   ;;  %vm92_vm1 = vcmask 261120  }
  0x1f   :  { %1068 = vmatpush3.bf16.msra.mxu0 %v1107_v1  ;;  %v1110_v4 = vld [vmem:[#allocation2 + $0xe4] ss:$16 sps:$4 sm:$0xff]   ;;  %v1115_v7 = vld [vmem:[#allocation2 + $0xe0] ss:$16 sps:$4 sm:$0xff]   ;;  %v1120_v9 = vld [vmem:[#allocation2 + $0xcc] ss:$16 sps:$4 sm:$0xff]  }
  0x20   :  { %1069 = vmatprep.subr.bf16.mxu0 %v1270_v0  ;;  %354 = vmatprep.subr.bf16.mxu1 %v1110_v4  ;;  %v1116_v8 = vld [vmem:[#allocation2 + $0xc4] ss:$16 sps:$4 sm:$0xff]   ;;  %v1121_v10 = vld [vmem:[#allocation2 + $0xc0] ss:$16 sps:$4 sm:$0xff]   ;;  %v1118_v12 = vld [vmem:[#allocation2 + $0xc8] ss:$16 sps:$4 sm:$0xff]  }
  0x21   :  { %355 = vmatpush1.bf16.msra.mxu1 %v1115_v7  ;;  %v1122_v11 = vld [vmem:[#allocation2 + $0xa4] ss:$16 sps:$4 sm:$0xff]   ;;  %v1126_v13 = vld [vmem:[#allocation2 + $0xac] ss:$16 sps:$4 sm:$0xff]   ;;  %v1127_v14 = vld [vmem:[#allocation2 + $0xa0] ss:$16 sps:$4 sm:$0xff]  }
  0x22   :  { %356 = vmatprep.subr.bf16.mxu1 %v1116_v8  ;;  %v1128_v15 = vld [vmem:[#allocation2 + $0x84] ss:$16 sps:$4 sm:$0xff]   ;;  %v1124_v16 = vld [vmem:[#allocation2 + $0xa8] ss:$16 sps:$4 sm:$0xff]   ;;  %v1132_v17 = vld [vmem:[#allocation2 + $0x8c] ss:$16 sps:$4 sm:$0xff]  }
  0x23   :  { %1070 = vmatpush3.bf16.msra.mxu0 %v1108_v2  ;;  %v1133_v18 = vld [vmem:[#allocation2 + $0x80] ss:$16 sps:$4 sm:$0xff]   ;;  %v1134_v19 = vld [vmem:[#allocation2 + $0x64] ss:$16 sps:$4 sm:$0xff]   ;;  %v1130_v20 = vld [vmem:[#allocation2 + $0x88] ss:$16 sps:$4 sm:$0xff]  }
  0x24   :  { %397 = vmatprep.subr.bf16.mxu0 %v1114_v6  ;;  %v1138_v21 = vld [vmem:[#allocation2 + $0x6c] ss:$16 sps:$4 sm:$0xff]   ;;  %v1139_v22 = vld [vmem:[#allocation2 + $0x60] ss:$16 sps:$4 sm:$0xff]   ;;  %v1140_v23 = vld [vmem:[#allocation2 + $0x44] ss:$16 sps:$4 sm:$0xff]  }
  0x25   :  { %357 = vmatpush1.bf16.msra.mxu1 %v1121_v10  ;;  %v1136_v24 = vld [vmem:[#allocation2 + $0x68] ss:$16 sps:$4 sm:$0xff]   ;;  %v1144_v25 = vld [vmem:[#allocation2 + $0x4c] ss:$16 sps:$4 sm:$0xff]   ;;  %v1145_v27 = vld [vmem:[#allocation2 + $0x40] ss:$16 sps:$4 sm:$0xff]  }
  0x26   :  { %1072 = vmatmul.mubr.msk.bf16.vlgmr.msra.gmra.mxu0 %vm92_vm1, %v1109_v3  ;;  %358 = vmatprep.subr.bf16.mxu1 %v1122_v11  ;;  %v1142_v26 = vld [vmem:[#allocation2 + $0x48] ss:$16 sps:$4 sm:$0xff]   ;;  %v1146_v28 = vld [vmem:[#allocation2 + $0x24] ss:$16 sps:$4 sm:$0xff]   ;;  %v1150_v29 = vld [vmem:[#allocation2 + $0x2c] ss:$16 sps:$4 sm:$0xff]  }
  0x27   :  { %398 = vmatpush1.bf16.msra.mxu0 %v1112_v5  ;;  %v1148_v30 = vld [vmem:[#allocation2 + $0x28] ss:$16 sps:$4 sm:$0xff]   ;;  %v1151_v31 = vld [vmem:[#allocation2 + $0x20] ss:$16 sps:$4 sm:$0xff]   ;;  %v1152_v32 = vld [vmem:[#allocation2 + $0x4] ss:$16 sps:$4 sm:$0xff]  }
  0x28   :  { %399 = vmatprep.subr.bf16.mxu0 %v1120_v9  ;;  %v1156_v33 = vld [vmem:[#allocation2 + $0xc] ss:$16 sps:$4 sm:$0xff]   ;;  %v1154_v34 = vld [vmem:[#allocation2 + $0x8] ss:$16 sps:$4 sm:$0xff]   ;;  %v1157_v35 = vld [vmem:[#allocation2] ss:$16 sps:$4 sm:$0xff]  }
  0x29   :  { %359 = vmatpush1.bf16.msra.mxu1 %v1127_v14  ;;  %v1272_v36 = vmov 0   ;;  %v1158_v37 = vld [vmem:[#allocation5 + $0x78] sm:$0xff]   ;;  %v932_v39 = vld [vmem:[%s1399_s2] ss:$0 sm:$0xff]  ;;  %v1162_v51 = vld [vmem:[#allocation5 + $0x70] sm:$0xff]   ;;  %s1273_s23 = smov [#allocation7]  }
  0x2a   :  { %360 = vmatprep.subr.bf16.mxu1 %v1128_v15  ;;  %386 = vmatprep.mubr.bf16.mxu1 %v1272_v36  ;;  %v1159_v38 = vld [vmem:[#allocation5 + $0xf8] sm:$0xff]   ;;  %v1163_v52 = vld [vmem:[#allocation5 + $0xf0] sm:$0xff]   ;;  %v1166_v55 = vld [vmem:[#allocation5 + $0x68] sm:$0xff]   ;;  %s919_s24 = sshll.u32 %s1273_s23, 4  ;;  %s920_s24 = int_to_ptr.vmem [resolvable:$true] %s919_s24 }
  0x2b   :  { %400 = vmatpush1.bf16.msra.mxu0 %v1118_v12  ;;  %429 = vmatprep.mubr.bf16.mxu0 %v1272_v36  ;;  %v1160_v48 = vld [vmem:[#allocation5 + $0x38] sm:$0xff]   ;;  %v1164_v53 = vld [vmem:[#allocation5 + $0x30] sm:$0xff]   ;;  %v1167_v56 = vld [vmem:[#allocation5 + $0xe8] sm:$0xff]   ;;  %s1238_s25 = scalar_lea.vmem %s920_s24, 256  ;;  %p1243_p11 = scmp.lt.s32.totalorder %s920_s24, %s920_s24 }
  0x2c   :  { %401 = vmatprep.subr.bf16.mxu0 %v1126_v13  ;;  %v1161_v49 = vld [vmem:[#allocation5 + $0xb8] sm:$0xff]   ;;  %v1165_v54 = vld [vmem:[#allocation5 + $0xb0] sm:$0xff]   ;;  %v1168_v57 = vld [vmem:[#allocation5 + $0x28] sm:$0xff]   ;;  %p1239_p10 = scmp.ne.s32.totalorder %s920_s24, %s1238_s25  ;;  %p1244_p12 = scmp.lt.s32.totalorder %s1238_s25, %s1238_s25 }
  0x2d   :  { %361 = vmatpush1.bf16.msra.mxu1 %v1133_v18  ;;  %v1169_v58 = vld [vmem:[#allocation5 + $0xa8] sm:$0xff]   ;;  %v1170_v59 = vld [vmem:[#allocation5 + $0x60] sm:$0xff]   ;;  %v1174_v63 = vld [vmem:[#allocation5 + $0x58] sm:$0xff]  }
  0x2e   :  { %362 = vmatprep.subr.bf16.mxu1 %v1134_v19  ;;  %v1171_v60 = vld [vmem:[#allocation5 + $0xe0] sm:$0xff]   ;;  %v1175_v1 = vld [vmem:[#allocation5 + $0xd8] sm:$0xff]   ;;  %v1178_v4 = vld [vmem:[#allocation5 + $0x50] sm:$0xff]   ;;  %p1245_p13 = por %p1244_p12, %p1243_p11 }
  0x2f   :  { %402 = vmatpush1.bf16.msra.mxu0 %v1124_v16  ;;  %v1172_v61 = vld [vmem:[#allocation5 + $0x20] sm:$0xff]   ;;  %v1176_v2 = vld [vmem:[#allocation5 + $0x18] sm:$0xff]   ;;  %v1179_v5 = vld [vmem:[#allocation5 + $0xd0] sm:$0xff]   ;;  %v174_v16 = vlaneseq }
  0x30   :  { %403 = vmatprep.subr.bf16.mxu0 %v1132_v17  ;;  %v1173_v62 = vld [vmem:[#allocation5 + $0xa0] sm:$0xff]   ;;  %v1177_v3 = vld [vmem:[#allocation5 + $0x98] sm:$0xff]   ;;  %v1180_v6 = vld [vmem:[#allocation5 + $0x10] sm:$0xff]   ;;  %p1246_p0 = pnand %p1245_p13, %p1239_p10 }
  0x31   :  { %363 = vmatpush1.bf16.msra.mxu1 %v1139_v22  ;;  %v1181_v7 = vld [vmem:[#allocation5 + $0x90] sm:$0xff]   ;;  %v1182_v8 = vld [vmem:[#allocation5 + $0x48] sm:$0xff]   ;;  %v1186_v12 = vld [vmem:[#allocation5 + $0x40] sm:$0xff]   ;;  %v175_v17 = vshrl.u32 %v174_v16, 7 }
  0x32   :  { %364 = vmatprep.subr.bf16.mxu1 %v1140_v23  ;;  %v1183_v9 = vld [vmem:[#allocation5 + $0xc8] sm:$0xff]   ;;  %v1187_v13 = vld [vmem:[#allocation5 + $0xc0] sm:$0xff]  }
  0x33   :  { %404 = vmatpush1.bf16.msra.mxu0 %v1130_v20  ;;  %v1184_v10 = vld [vmem:[#allocation5 + $0x8] sm:$0xff]   ;;  %v1188_v14 = vld [vmem:[#allocation5] sm:$0xff]   ;;  %v180_v18 = vsub.s32 1, %v175_v17  ;;  %v188_v19 = vsub.s32 3, %v175_v17  ;;  %v176_v20 = vsub.s32 0, %v175_v17 }
  0x34   :  { %405 = vmatprep.subr.bf16.mxu0 %v1138_v21  ;;  %v1185_v11 = vld [vmem:[#allocation5 + $0x88] sm:$0xff]   ;;  %v1189_v15 = vld [vmem:[#allocation5 + $0x80] sm:$0xff]   ;;  %v184_v21 = vsub.s32 2, %v175_v17 }
  0x35   :  { %365 = vmatpush1.bf16.msra.mxu1 %v1145_v27  ;;  %v172_v22 = vld [vmem:[%s1401_s4] sm:$0xf] }
  0x36   :  { %366 = vmatprep.subr.bf16.mxu1 %v1146_v28  ;;  %v177_v27 = vrot.slane %v172_v22, %v176_v20  ;;  %v185_v28 = vrot.slane %v172_v22, %v184_v21 }
  0x37   :  { %406 = vmatpush1.bf16.msra.mxu0 %v1136_v24 }
  0x38   :  { %407 = vmatprep.subr.bf16.mxu0 %v1144_v25  ;;  %v181_v25 = vrot.slane %v172_v22, %v180_v18 }
  0x39   :  { %367 = vmatpush1.bf16.msra.mxu1 %v1151_v31 }
  0x3a   :  { %368 = vmatprep.subr.bf16.mxu1 %v1152_v32 }
  0x3b   :  { %408 = vmatpush1.bf16.msra.mxu0 %v1142_v26  ;;  %v189_v26 = vrot.slane %v172_v22, %v188_v19  ;;  %v1002_v19 = vld [vmem:[%s1405_s8] ss:$0 sm:$0xff] }
  0x3c   :  { %409 = vmatprep.subr.bf16.mxu0 %v1150_v29 }
  0x3d   :  { %369 = vmatpush1.bf16.msra.mxu1 %v1157_v35 }
  0x3e   :  { %1014 = vmatprep.subr.bf16.mxu1 %v1158_v37 }
  0x3f   :  { %410 = vmatpush1.bf16.msra.mxu0 %v1148_v30 }
  0x40   :  { %411 = vmatprep.subr.bf16.mxu0 %v1156_v33 }
  0x43   :  { %412 = vmatpush1.bf16.msra.mxu0 %v1154_v34 }
  0x44   :  { %1036 = vmatprep.subr.bf16.mxu0 %v1159_v38 }
  0xe6   :  { %v130_v40 = vpop.f32.mrf.mxu0 }
  0xe7   :  { %v131_v42 = vadd.f32 %v932_v39, %v130_v40 }
  0xe8   :  { %v1073_v41 = vpop.f32.mrf.mxu0 }
  0xe9   :  { %v137_v46 = vmax.f32 %v131_v42, 0.0 }
  0xea   :  { %v133_v43 = vpop.f32.mrf.mxu0 }
  0xeb   :  { %v134_v44 = vadd.f32 %v932_v39, %v133_v43 }
  0xec   :  { %v1074_v45 = vpop.f32.mrf.mxu0 }
  0xed   :  { %v138_v47 = vmax.f32 %v134_v44, 0.0 }
  0xef   :  { %v139_v50 = vpack.c.bf16 %v138_v47, %v137_v46 }
  0xf1   :  { %387 = vmatmul.mubr.bf16.vlgmr.msra.gmra.mxu1 %v139_v50  ;;  %430 = vmatmul.mubr.bf16.vlgmr.msra.gmra.mxu0 %v139_v50 }
  0xf2   :  { %1015 = vmatpush3.bf16.msra.mxu1 %v1160_v48  ;;  %1037 = vmatpush3.bf16.msra.mxu0 %v1161_v49 }
  0xf3   :  { %1016 = vmatprep.subr.bf16.mxu1 %v1162_v51  ;;  %1038 = vmatprep.subr.bf16.mxu0 %v1163_v52 }
  0xf6   :  { %1017 = vmatpush3.bf16.msra.mxu1 %v1164_v53  ;;  %1039 = vmatpush3.bf16.msra.mxu0 %v1165_v54  ;;  %v1190_v53 = vld [vmem:[%s1404_s7 + $0x38] sm:$0xff]  }
  0xf7   :  { %1018 = vmatprep.subr.bf16.mxu1 %v1166_v55  ;;  %1040 = vmatprep.subr.bf16.mxu0 %v1167_v56  ;;  %v1191_v56 = vld [vmem:[%s1404_s7 + $0x30] sm:$0xff]  }
  0xfa   :  { %1019 = vmatpush3.bf16.msra.mxu1 %v1168_v57  ;;  %1041 = vmatpush3.bf16.msra.mxu0 %v1169_v58  ;;  %v1192_v57 = vld [vmem:[%s1404_s7 + $0x28] sm:$0xff]   ;;  %v1193_v58 = vld [vmem:[%s1404_s7 + $0x20] sm:$0xff]  }
  0xfb   :  { %1020 = vmatprep.subr.bf16.mxu1 %v1170_v59  ;;  %1042 = vmatprep.subr.bf16.mxu0 %v1171_v60  ;;  %v1194_v59 = vld [vmem:[%s1404_s7 + $0x18] sm:$0xff]   ;;  %v1195_v60 = vld [vmem:[%s1404_s7 + $0x10] sm:$0xff]  }
  0xfe   :  { %1021 = vmatpush3.bf16.msra.mxu1 %v1172_v61  ;;  %1043 = vmatpush3.bf16.msra.mxu0 %v1173_v62  ;;  %v1196_v61 = vld [vmem:[%s1404_s7 + $0x8] sm:$0xff]   ;;  %v1197_v62 = vld [vmem:[%s1404_s7] sm:$0xff]  }
  0xff   :  { %1022 = vmatprep.subr.bf16.mxu1 %v1174_v63  ;;  %1044 = vmatprep.subr.bf16.mxu0 %v1175_v1 }
 0x102   :  { %1023 = vmatpush3.bf16.msra.mxu1 %v1176_v2  ;;  %1045 = vmatpush3.bf16.msra.mxu0 %v1177_v3  ;;  %v969_v2 = vld [vmem:[%s1403_s6] ss:$0 sm:$0xff] }
 0x103   :  { %1024 = vmatprep.subr.bf16.mxu1 %v1178_v4  ;;  %1046 = vmatprep.subr.bf16.mxu0 %v1179_v5 }
 0x106   :  { %1025 = vmatpush3.bf16.msra.mxu1 %v1180_v6  ;;  %1047 = vmatpush3.bf16.msra.mxu0 %v1181_v7 }
 0x107   :  { %1026 = vmatprep.subr.bf16.mxu1 %v1182_v8  ;;  %1048 = vmatprep.subr.bf16.mxu0 %v1183_v9 }
 0x10a   :  { %1027 = vmatpush3.bf16.msra.mxu1 %v1184_v10  ;;  %1049 = vmatpush3.bf16.msra.mxu0 %v1185_v11 }
 0x10b   :  { %1028 = vmatprep.subr.bf16.mxu1 %v1186_v12  ;;  %1050 = vmatprep.subr.bf16.mxu0 %v1187_v13 }
 0x10e   :  { %1029 = vmatpush3.bf16.msra.mxu1 %v1188_v14  ;;  %1051 = vmatpush3.bf16.msra.mxu0 %v1189_v15 }
 0x10f   :  { %1075 = vmatprep.subr.bf16.mxu1 %v1270_v0 }
 0x1b1   :  { %v388_v23 = vpop.f32.mrf.mxu1  ;;  %v431_v24 = vpop.f32.mrf.mxu0 }
 0x1b2   :  { %v389_v37 = vadd.f32 %v388_v23, %v177_v27  ;;  %v432_v38 = vadd.f32 %v431_v24, %v185_v28 }
 0x1b3   :  { %v390_v29 = vpop.f32.mrf.mxu1  ;;  %v433_v30 = vpop.f32.mrf.mxu0 }
 0x1b4   :  { %v391_v33 = vadd.f32 %v390_v29, %v181_v25  ;;  %v434_v34 = vadd.f32 %v433_v30, %v189_v26  ;;  %v440_v49 = vmax.f32 %v389_v37, 0.0  ;;  %v442_v50 = vmax.f32 %v432_v38, 0.0 }
 0x1b5   :  { %v392_v31 = vpop.f32.mrf.mxu1  ;;  %v435_v32 = vpop.f32.mrf.mxu0 }
 0x1b6   :  { %v393_v35 = vadd.f32 %v392_v31, %v177_v27  ;;  %v436_v36 = vadd.f32 %v435_v32, %v185_v28  ;;  %v441_v45 = vmax.f32 %v391_v33, 0.0  ;;  %v443_v46 = vmax.f32 %v434_v34, 0.0 }
 0x1b7   :  { %v394_v39 = vpop.f32.mrf.mxu1  ;;  %v437_v40 = vpop.f32.mrf.mxu0 }
 0x1b8   :  { %v395_v41 = vadd.f32 %v394_v39, %v181_v25  ;;  %v438_v42 = vadd.f32 %v437_v40, %v189_v26  ;;  %v444_v43 = vmax.f32 %v393_v35, 0.0  ;;  %v446_v44 = vmax.f32 %v436_v36, 0.0 }
 0x1ba   :  { %v445_v47 = vmax.f32 %v395_v41, 0.0  ;;  %v447_v48 = vmax.f32 %v438_v42, 0.0  ;;  %v448_v54 = vpack.c.bf16 %v444_v43, %v440_v49  ;;  %v450_v55 = vpack.c.bf16 %v446_v44, %v442_v50 }
 0x1bc   :  { %v449_v51 = vpack.c.bf16 %v445_v47, %v441_v45  ;;  %v451_v52 = vpack.c.bf16 %v447_v48, %v443_v46 }
 0x1be   :  { %747 = vmatprep.mubr.bf16.mxu1 %v449_v51  ;;  %788 = vmatprep.mubr.bf16.mxu0 %v451_v52 }
 0x1bf   :  { %748 = vmatmul.mubr.bf16.vlgmr.msra.gmra.mxu1 %v448_v54  ;;  %789 = vmatmul.mubr.bf16.vlgmr.msra.gmra.mxu0 %v450_v55 }
 0x1c0   :  { %1076 = vmatpush3.bf16.msra.mxu1 %v1190_v53  ;;  %1091 = vmatprep.mubr.msk.bf16.mxu1 %vm1271_vm0, %v1270_v0 }
 0x1c1   :  { %1077 = vmatprep.subr.bf16.mxu1 %v1270_v0 }
 0x1c4   :  { %1078 = vmatpush3.bf16.msra.mxu1 %v1191_v56 }
 0x1c5   :  { %1079 = vmatprep.subr.bf16.mxu1 %v1270_v0 }
 0x1c8   :  { %1080 = vmatpush3.bf16.msra.mxu1 %v1192_v57 }
 0x1c9   :  { %1081 = vmatprep.subr.bf16.mxu1 %v1270_v0 }
 0x1cc   :  { %1082 = vmatpush3.bf16.msra.mxu1 %v1193_v58 }
 0x1cd   :  { %1083 = vmatprep.subr.bf16.mxu1 %v1270_v0 }
 0x1d0   :  { %1084 = vmatpush3.bf16.msra.mxu1 %v1194_v59 }
 0x1d1   :  { %1085 = vmatprep.subr.bf16.mxu1 %v1270_v0 }
 0x1d4   :  { %1086 = vmatpush3.bf16.msra.mxu1 %v1195_v60 }
 0x1d5   :  { %1087 = vmatprep.subr.bf16.mxu1 %v1270_v0 }
 0x1d8   :  { %1088 = vmatpush3.bf16.msra.mxu1 %v1196_v61 }
 0x1d9   :  { %1089 = vmatprep.subr.bf16.mxu1 %v1270_v0 }
 0x1dc   :  { %1090 = vmatpush3.bf16.msra.mxu1 %v1197_v62 }
 0x27f   :  { %v1030_v63 = vpop.f32.mrf.mxu1  ;;  %v1052_v1 = vpop.f32.mrf.mxu0 }
 0x281   :  { %v1031_v3 = vpop.f32.mrf.mxu1  ;;  %v1053_v4 = vpop.f32.mrf.mxu0 }
 0x282   :  { %v1032_v5 = vadd.f32 %v1031_v3, %v1030_v63  ;;  %v1054_v0 = vadd.f32 %v1053_v4, %v1052_v1 }
 0x283   :  { %v1033_v6 = vpop.f32.mrf.mxu1  ;;  %v1055_v7 = vpop.f32.mrf.mxu0 }
 0x284   :  { %v750_v8 = vadd.f32 %v1032_v5, %v969_v2 }
 0x285   :  { %v1034_v9 = vpop.f32.mrf.mxu1  ;;  %v1056_v10 = vpop.f32.mrf.mxu0 }
 0x286   :  { %v1035_v11 = vadd.f32 %v1034_v9, %v1033_v6  ;;  %v791_v12 = vadd.f32 %v1054_v0, %v750_v8  ;;  %v1057_v14 = vadd.f32 %v1056_v10, %v1055_v7 }
 0x288   :  { %v753_v13 = vadd.f32 %v1035_v11, %v969_v2  ;;  %v797_v16 = vmax.f32 %v791_v12, 0.0 }
 0x28a   :  { %v794_v15 = vadd.f32 %v1057_v14, %v753_v13 }
 0x28c   :  { %v798_v17 = vmax.f32 %v794_v15, 0.0 }
 0x28e   :  { %v799_v18 = vpack.c.bf16 %v798_v17, %v797_v16 }
 0x290   :  { %1092 = vmatmul.mubr.bf16.vlgmr.msra.gmra.mxu1 %v799_v18 }
 0x350   :  { %v905_v20 = vpop.f32.mrf.mxu1 }
 0x351   :  { %v906_v21 = vadd.f32 %v1002_v19, %v905_v20 }
 0x352   :  { %v1093_v22 = vpop.f32.mrf.mxu1 }
 0x353   :  { %912 = vst.msk [vmem:[#allocation7] sm:$0xff] %vm92_vm1, %v906_v21 }
 0x354   :  { %v908_v23 = vpop.f32.mrf.mxu1 }
 0x355   :  { %v909_v24 = vadd.f32 %v1002_v19, %v908_v23 }
 0x356   :  { %v1094_v25 = vpop.f32.mrf.mxu1 }
 0x357   :  { %913 = vst.msk [vmem:[#allocation7 + $0x8] sm:$0xff] %vm92_vm1, %v909_v24 }
 0x358   :  { %1249 = shalt.err (!%p1246_p0)
}
 0x359   :  { %s1274_s8 = smov 128   ;;  %s1275_s5 = smov 8  }
 0x35a   :  { %925 = dma.vmem_to_hbm [thread:$0]  %s920_s24, 256, %s1406_s9, [#allocation4], %s1274_s8, %s1274_s8, %s1275_s5  }
 0x35b   :  { %1262 = dma.done.wait [#allocation4], 256  }
 0x35c   :  { %1263 = vsyncadd [#allocation4], 4294967040 }
 0x35d   :  { %929 = vsyncpa [#allocation3], 1 }
 0x35e   :  { %930 = vsyncpa [#allocation6], 1 }
 0x35f   :  { %931 = vsyncpa [#allocation4], 1 }

</bundles_post_ra>
